<compile_context>
chip_gen: v5e
topology: v5e:2x2
jax: 0.10.0
libtpu: 0.0.40
codegen_flags: <defaults>
</compile_context>

<pallas_src>
import functools

import jax
import jax.numpy as jnp
from jax.experimental import pallas as pl
from jax.experimental.pallas import tpu as pltpu


# ---------------------------------------------------------------------------
# Kernel: one batch tile of the whole MLP forward.  Both heads are computed by
# a single matmul against the concatenated head weights (H, 2*A).
# ---------------------------------------------------------------------------
def _nn_policy_kernel(x_ref, w1_ref, b1_ref, w2_ref, b2_ref, wh_ref, bh_ref,
                      out_ref, *, nonlin):
    cdt = w1_ref.dtype                      # compute dtype (bf16 by default)

    x = x_ref[...].astype(cdt)
    h1 = jnp.dot(x, w1_ref[...], preferred_element_type=jnp.float32) + b1_ref[...]
    h1 = jnp.maximum(h1, 0.0) if nonlin == "relu" else jnp.tanh(h1)

    h2 = jnp.dot(h1.astype(cdt), w2_ref[...],
                 preferred_element_type=jnp.float32) + b2_ref[...]
    h2 = jnp.maximum(h2, 0.0) if nonlin == "relu" else jnp.tanh(h2)

    # fused mean/log_std heads: one matmul, one wide store.
    heads = jnp.dot(h2.astype(cdt), wh_ref[...],
                    preferred_element_type=jnp.float32) + bh_ref[...]
    out_ref[...] = heads.astype(out_ref.dtype)


def _round_up(x, m):
    return ((x + m - 1) // m) * m


def _choose_batch_tile(B):
    """Sublane-aligned batch tile.  >=2 grid steps for moderate B (v7x dual
    TensorCores), tiles capped near 1024 rows, padding bounded to <8 rows/tile."""
    if B <= 8:
        return _round_up(max(B, 1), 8)
    n_steps = max(2, pl.cdiv(B, 1024))
    return _round_up(pl.cdiv(B, n_steps), 8)


# ---------------------------------------------------------------------------
# One-time parameter preparation (hoisted out of the per-call path):
#   * fuse mean / log_std head weights & biases
#   * pre-cast matmul weights to the compute dtype (bf16 by default)
# ---------------------------------------------------------------------------
def prepare_params(params, compute_dtype=jnp.bfloat16):
    wh = jnp.concatenate([params["wm"], params["ws"]], axis=1)
    bh = jnp.concatenate([params["bm"], params["bs"]], axis=1)
    return dict(
        w1=params["w1"].astype(compute_dtype),
        b1=params["b1"].astype(jnp.float32),
        w2=params["w2"].astype(compute_dtype),
        b2=params["b2"].astype(jnp.float32),
        wh=wh.astype(compute_dtype),
        bh=bh.astype(jnp.float32),
        num_actions=params["wm"].shape[1],
    )


def nn_policy_forward(state, prepped, *, nonlin="relu"):
    """Pallas implementation of NNPolicy.forward -> (mean, log_std)."""
    B, num_inputs = state.shape
    H = prepped["w1"].shape[1]
    A = prepped["num_actions"]
    two_a = 2 * A

    TB = _choose_batch_tile(B)
    n_tiles = pl.cdiv(B, TB)
    B_pad = TB * n_tiles
    x = state if B_pad == B else jnp.pad(state, ((0, B_pad - B), (0, 0)))

    itemsize = jnp.dtype(prepped["w1"].dtype).itemsize
    flops = 2 * B_pad * (num_inputs * H + H * H + H * two_a)
    transcendentals = 2 * B_pad * H if nonlin == "tanh" else 0
    bytes_accessed = (4 * (x.size + B_pad * two_a)
                      + itemsize * (prepped["w1"].size + prepped["w2"].size
                                    + prepped["wh"].size)
                      + 4 * (prepped["b1"].size + prepped["b2"].size
                             + prepped["bh"].size))

    # Resident blocks: never change block index -> single buffer is enough.
    def resident(arr):
        return pl.BlockSpec(arr.shape, lambda i: (0, 0),
                            pipeline_mode=pl.Buffered(1))

    kernel = functools.partial(_nn_policy_kernel, nonlin=nonlin)

    out = pl.pallas_call(
        kernel,
        out_shape=jax.ShapeDtypeStruct((B_pad, two_a), jnp.float32),
        grid=(n_tiles,),
        in_specs=[
            pl.BlockSpec((TB, num_inputs), lambda i: (i, 0)),   # state tile
            resident(prepped["w1"]), resident(prepped["b1"]),
            resident(prepped["w2"]), resident(prepped["b2"]),
            resident(prepped["wh"]), resident(prepped["bh"]),
        ],
        out_specs=pl.BlockSpec((TB, two_a), lambda i: (i, 0)),
        compiler_params=pltpu.CompilerParams(
            dimension_semantics=("parallel",)),
        cost_estimate=pl.CostEstimate(
            flops=flops, transcendentals=transcendentals,
            bytes_accessed=bytes_accessed),
    )(x, prepped["w1"], prepped["b1"], prepped["w2"], prepped["b2"],
      prepped["wh"], prepped["bh"])

    mean = out[:B, :A]
    log_std = out[:B, A:]
    return mean, log_std


# ---------------------------------------------------------------------------
# Deterministic parameter construction (mimics nn.Linear default init; the
# mean / log_std head weights & biases are multiplied by 0.0 as in __init__).
# ---------------------------------------------------------------------------
def init_params(key, num_inputs, num_actions, hidden_dim, zero_heads=True):
    def linear_init(k, fan_in, fan_out):
        kw, kb = jax.random.split(k)
        bound = 1.0 / jnp.sqrt(jnp.float32(fan_in))
        # stored as (in, out): equivalent to torch weight (out, in) transposed
        w = jax.random.uniform(kw, (fan_in, fan_out), jnp.float32, -bound, bound)
        b = jax.random.uniform(kb, (1, fan_out), jnp.float32, -bound, bound)
        return w, b

    k1, k2, k3, k4 = jax.random.split(key, 4)
    w1, b1 = linear_init(k1, num_inputs, hidden_dim)
    w2, b2 = linear_init(k2, hidden_dim, hidden_dim)
    wm, bm = linear_init(k3, hidden_dim, num_actions)
    ws, bs = linear_init(k4, hidden_dim, num_actions)
    if zero_heads:  # NNPolicy.__init__ zeroes the head params
        wm, bm = wm * 0.0, bm * 0.0
        ws, bs = ws * 0.0, bs * 0.0
    return dict(w1=w1, b1=b1, w2=w2, b2=b2, wm=wm, bm=bm, ws=ws, bs=bs)


def reference_forward(state, p, nonlin="relu", matmul_dtype=jnp.float32):
    def mm(a, w):
        return jnp.dot(a.astype(matmul_dtype), w.astype(matmul_dtype),
                       preferred_element_type=jnp.float32)

    act = (lambda z: jnp.maximum(z, 0.0)) if nonlin == "relu" else jnp.tanh
    h1 = act(mm(state, p["w1"]) + p["b1"])
    h2 = act(mm(h1, p["w2"]) + p["b2"])
    return mm(h2, p["wm"]) + p["bm"], mm(h2, p["ws"]) + p["bs"]


if __name__ == "__main__":
    key = jax.random.PRNGKey(0)
    num_inputs, num_actions, hidden_dim = 16, 8, 32

    k_state, k_state_big, k_params = jax.random.split(key, 3)

    # Small shape (single-tile path) and a mid-size batch (multi-tile,
    # non-divisible path with last-tile padding).
    cases = [
        jax.random.normal(k_state, (2, num_inputs), jnp.float32),
        jax.random.normal(k_state_big, (300, num_inputs), jnp.float32),
    ]

    for nonlin in ("relu", "tanh"):
        for zero_heads in (True, False):  # non-zero heads exercise the fused head matmul
            params = init_params(k_params, num_inputs, num_actions, hidden_dim,
                                 zero_heads=zero_heads)
            prepped = prepare_params(params)   # one-time: fuse heads + bf16 cast

            for state in cases:
                B = state.shape[0]
                mean, log_std = nn_policy_forward(state, prepped, nonlin=nonlin)
                jax.block_until_ready((mean, log_std))

                assert mean.shape == (B, num_actions)
                assert log_std.shape == (B, num_actions)

                # Exact-path check: same bf16-operand / f32-accumulate math.
                rm_bf, rs_bf = reference_forward(state, params, nonlin,
                                                 matmul_dtype=jnp.bfloat16)
                assert jnp.allclose(mean, rm_bf, atol=1e-4, rtol=1e-4)
                assert jnp.allclose(log_std, rs_bf, atol=1e-4, rtol=1e-4)

                # Sanity check against the full-f32 reference (bf16 rounding).
                rm_f32, rs_f32 = reference_forward(state, params, nonlin)
                assert jnp.allclose(mean, rm_f32, atol=5e-2, rtol=5e-2)
                assert jnp.allclose(log_std, rs_f32, atol=5e-2, rtol=5e-2)

    print("KERNEL_OK")
</pallas_src>

<mosaic_0001>
module attributes {stable_mosaic.version = 11 : i64} {
  func.func @_nn_policy_kernel(%arg0: i32, %arg1: memref<8x16xf32, #tpu.memory_space<vmem>>, %arg2: memref<16x32xbf16, #tpu.memory_space<vmem>>, %arg3: memref<1x32xf32, #tpu.memory_space<vmem>>, %arg4: memref<32x32xbf16, #tpu.memory_space<vmem>>, %arg5: memref<1x32xf32, #tpu.memory_space<vmem>>, %arg6: memref<32x16xbf16, #tpu.memory_space<vmem>>, %arg7: memref<1x16xf32, #tpu.memory_space<vmem>>, %arg8: memref<8x16xf32, #tpu.memory_space<vmem>>) attributes {dimension_semantics = [#tpu.dimension_semantics<parallel>], iteration_bounds = array<i64: 1>, scalar_prefetch = 0 : i64, scratch_operands = 0 : i64, tpu.core_type = #tpu.core_type<tc>, window_params = [{transform_indices = @transform_0, window_bounds = array<i64: 8, 16>}, {pipeline_mode = #tpu.pipeline_mode<synchronous>, transform_indices = @transform_1, window_bounds = array<i64: 16, 32>}, {pipeline_mode = #tpu.pipeline_mode<synchronous>, transform_indices = @transform_2, window_bounds = array<i64: 1, 32>}, {pipeline_mode = #tpu.pipeline_mode<synchronous>, transform_indices = @transform_3, window_bounds = array<i64: 32, 32>}, {pipeline_mode = #tpu.pipeline_mode<synchronous>, transform_indices = @transform_4, window_bounds = array<i64: 1, 32>}, {pipeline_mode = #tpu.pipeline_mode<synchronous>, transform_indices = @transform_5, window_bounds = array<i64: 32, 16>}, {pipeline_mode = #tpu.pipeline_mode<synchronous>, transform_indices = @transform_6, window_bounds = array<i64: 1, 16>}, {transform_indices = @transform_7, window_bounds = array<i64: 8, 16>}]} {
    %c0 = arith.constant 0 : index
    %c0_0 = arith.constant 0 : index
    %0 = vector.load %arg1[%c0, %c0_0] : memref<8x16xf32, #tpu.memory_space<vmem>>, vector<8x16xf32>
    %1 = arith.truncf %0 : vector<8x16xf32> to vector<8x16xbf16>
    %c0_1 = arith.constant 0 : index
    %c0_2 = arith.constant 0 : index
    %2 = vector.load %arg2[%c0_1, %c0_2] : memref<16x32xbf16, #tpu.memory_space<vmem>>, vector<16x32xbf16>
    %cst = arith.constant dense<0.000000e+00> : vector<8x32xf32>
    %3 = tpu.matmul %1, %2, %cst {dimension_numbers = #tpu.dot_dimension_numbers<[1], [0], [0], [1], [0, 0, 1, 1], [], []>} : vector<8x16xbf16>, vector<16x32xbf16>, vector<8x32xf32> -> vector<8x32xf32>
    %c0_3 = arith.constant 0 : index
    %c0_4 = arith.constant 0 : index
    %4 = vector.load %arg3[%c0_3, %c0_4] : memref<1x32xf32, #tpu.memory_space<vmem>>, vector<1x32xf32>
    %5 = vector.broadcast %4 : vector<1x32xf32> to vector<8x32xf32>
    %6 = arith.addf %3, %5 : vector<8x32xf32>
    %cst_5 = arith.constant 0.000000e+00 : f32
    %7 = vector.broadcast %cst_5 : f32 to vector<8x32xf32>
    %8 = arith.maximumf %6, %7 : vector<8x32xf32>
    %9 = arith.truncf %8 : vector<8x32xf32> to vector<8x32xbf16>
    %c0_6 = arith.constant 0 : index
    %c0_7 = arith.constant 0 : index
    %10 = vector.load %arg4[%c0_6, %c0_7] : memref<32x32xbf16, #tpu.memory_space<vmem>>, vector<32x32xbf16>
    %cst_8 = arith.constant dense<0.000000e+00> : vector<8x32xf32>
    %11 = tpu.matmul %9, %10, %cst_8 {dimension_numbers = #tpu.dot_dimension_numbers<[1], [0], [0], [1], [0, 0, 1, 1], [], []>} : vector<8x32xbf16>, vector<32x32xbf16>, vector<8x32xf32> -> vector<8x32xf32>
    %c0_9 = arith.constant 0 : index
    %c0_10 = arith.constant 0 : index
    %12 = vector.load %arg5[%c0_9, %c0_10] : memref<1x32xf32, #tpu.memory_space<vmem>>, vector<1x32xf32>
    %13 = vector.broadcast %12 : vector<1x32xf32> to vector<8x32xf32>
    %14 = arith.addf %11, %13 : vector<8x32xf32>
    %cst_11 = arith.constant 0.000000e+00 : f32
    %15 = vector.broadcast %cst_11 : f32 to vector<8x32xf32>
    %16 = arith.maximumf %14, %15 : vector<8x32xf32>
    %17 = arith.truncf %16 : vector<8x32xf32> to vector<8x32xbf16>
    %c0_12 = arith.constant 0 : index
    %c0_13 = arith.constant 0 : index
    %18 = vector.load %arg6[%c0_12, %c0_13] : memref<32x16xbf16, #tpu.memory_space<vmem>>, vector<32x16xbf16>
    %cst_14 = arith.constant dense<0.000000e+00> : vector<8x16xf32>
    %19 = tpu.matmul %17, %18, %cst_14 {dimension_numbers = #tpu.dot_dimension_numbers<[1], [0], [0], [1], [0, 0, 1, 1], [], []>} : vector<8x32xbf16>, vector<32x16xbf16>, vector<8x16xf32> -> vector<8x16xf32>
    %c0_15 = arith.constant 0 : index
    %c0_16 = arith.constant 0 : index
    %20 = vector.load %arg7[%c0_15, %c0_16] : memref<1x16xf32, #tpu.memory_space<vmem>>, vector<1x16xf32>
    %21 = vector.broadcast %20 : vector<1x16xf32> to vector<8x16xf32>
    %22 = arith.addf %19, %21 : vector<8x16xf32>
    %c0_17 = arith.constant 0 : index
    %c0_18 = arith.constant 0 : index
    %23 = vector.load %arg8[%c0_17, %c0_18] : memref<8x16xf32, #tpu.memory_space<vmem>>, vector<8x16xf32>
    tpu.vector_store %arg8[%c0_17, %c0_18], %22 {strides = array<i32>} : memref<8x16xf32, #tpu.memory_space<vmem>>, vector<8x16xf32>,
    return
  }
  func.func @transform_0(%arg0: i32) -> (i32, i32) {
    %c0_i32 = arith.constant 0 : i32
    %c0_i32_0 = arith.constant 0 : i32
    return %arg0, %c0_i32 : i32, i32
  }
  func.func @transform_1(%arg0: i32) -> (i32, i32) {
    %c0_i32 = arith.constant 0 : i32
    %c0_i32_0 = arith.constant 0 : i32
    %c0_i32_1 = arith.constant 0 : i32
    return %c0_i32, %c0_i32_0 : i32, i32
  }
  func.func @transform_2(%arg0: i32) -> (i32, i32) {
    %c0_i32 = arith.constant 0 : i32
    %c0_i32_0 = arith.constant 0 : i32
    %c0_i32_1 = arith.constant 0 : i32
    return %c0_i32, %c0_i32_0 : i32, i32
  }
  func.func @transform_3(%arg0: i32) -> (i32, i32) {
    %c0_i32 = arith.constant 0 : i32
    %c0_i32_0 = arith.constant 0 : i32
    %c0_i32_1 = arith.constant 0 : i32
    return %c0_i32, %c0_i32_0 : i32, i32
  }
  func.func @transform_4(%arg0: i32) -> (i32, i32) {
    %c0_i32 = arith.constant 0 : i32
    %c0_i32_0 = arith.constant 0 : i32
    %c0_i32_1 = arith.constant 0 : i32
    return %c0_i32, %c0_i32_0 : i32, i32
  }
  func.func @transform_5(%arg0: i32) -> (i32, i32) {
    %c0_i32 = arith.constant 0 : i32
    %c0_i32_0 = arith.constant 0 : i32
    %c0_i32_1 = arith.constant 0 : i32
    return %c0_i32, %c0_i32_0 : i32, i32
  }
  func.func @transform_6(%arg0: i32) -> (i32, i32) {
    %c0_i32 = arith.constant 0 : i32
    %c0_i32_0 = arith.constant 0 : i32
    %c0_i32_1 = arith.constant 0 : i32
    return %c0_i32, %c0_i32_0 : i32, i32
  }
  func.func @transform_7(%arg0: i32) -> (i32, i32) {
    %c0_i32 = arith.constant 0 : i32
    %c0_i32_0 = arith.constant 0 : i32
    return %arg0, %c0_i32 : i32, i32
  }
}

</mosaic_0001>

<bundles_post_ra>
// kernel: tpu_custom_call.1
= control target key start
LH: loop header
LB: loop body
LE: loop exit
PB: predicated region body
PF: predicated region fallthrough
CT: control target
= control target key end

     0   :  { %12 = vsyncpa [#allocation3], 0  ;;  %s333_s0 = inlined_call_operand.vmem [shape: f32[8,16], index: 0, kind: input, shape index: {}]   ;;  %s334_s1 = inlined_call_operand.hbm [shape: bf16[16,32], index: 1, kind: input, shape index: {}]   ;;  %s335_s2 = inlined_call_operand.vmem [shape: f32[1,32], index: 2, kind: input, shape index: {}]   ;;  %s336_s3 = inlined_call_operand.vmem [shape: bf16[32,32], index: 3, kind: input, shape index: {}]   ;;  %s337_s4 = inlined_call_operand.vmem [shape: f32[1,32], index: 4, kind: input, shape index: {}]   ;;  %s338_s5 = inlined_call_operand.vmem [shape: bf16[32,16], index: 5, kind: input, shape index: {}]   ;;  %s339_s6 = inlined_call_operand.vmem [shape: f32[1,16], index: 6, kind: input, shape index: {}]   ;;  %s340_s7 = inlined_call_operand.hbm [shape: f32[8,16], index: 7, kind: output, shape index: {}]  }
   0x1   :  { %13 = vsyncpa [#allocation4], 0  ;;  %s20_s26 = sshll.u32 %s334_s1, 4  ;;  %s257_s27 = smov [#allocation2]   ;;  %s21_s26 = int_to_ptr.hbm [resolvable:$true] %s20_s26 }
   0x2   :  { %s22_s28 = sshll.u32 %s257_s27, 4  ;;  %s258_s29 = smov 64   ;;  %s23_s28 = int_to_ptr.vmem [resolvable:$true] %s22_s28 }
   0x3   :  { %s259_s30 = smov 4  }
   0x4   :  { %28 = dma.hbm_to_vmem [thread:$0]  %s21_s26, 128, %s23_s28, [#allocation3], %s258_s29, %s258_s29, %s259_s30  }
   0x5   :  { %253 = dma.done.wait [#allocation3], 128  }
   0x6   :  { %254 = vsyncadd [#allocation3], 4294967168  ;;  %v193_v0 = vld [vmem:[#allocation2] sm:$0xff]  ;;  %vm58_vm0 = vcmask 130048   ;;  %v195_v3 = vld [vmem:[%s336_s3 + $0x8] sm:$0xff]  ;;  %vm97_vm1 = vcmask 261120  }
   0x7   :  { %v44_v1 = vld [vmem:[%s333_s0] sm:$0xff]  ;;  %69 = vmatpush.bf16.msra.mxu0 %v193_v0  ;;  %107 = vmatpush.bf16.msra.mxu1 %v195_v3  ;;  %v197_v11 = vld [vmem:[%s338_s5 + $0x8] sm:$0xff]  ;;  %s260_s20 = smov [#allocation5]  }
   0x8   :  { %v45_v2 = vpack.c.bf16 %v44_v1, %v44_v1  ;;  %v194_v4 = vld [vmem:[%s336_s3] sm:$0xff]  ;;  %145 = vmatpush.bf16.msra.mxu2 %v197_v11  ;;  %s158_s21 = sshll.u32 %s260_s20, 4  ;;  %s159_s21 = int_to_ptr.vmem [resolvable:$true] %s158_s21 }
   0x9   :  { %v202_v5 = vld [vmem:[%s335_s2] ss:$0 sm:$0xff] }
   0xa   :  { %174 = vmatmul.msk.bf16.vlgmr.msra.gmra.mxu0 %vm58_vm0, %v45_v2  ;;  %v196_v12 = vld [vmem:[%s338_s5] sm:$0xff]  ;;  %s160_s5 = sshll.u32 %s340_s7, 4  ;;  %s161_s5 = int_to_ptr.hbm [resolvable:$true] %s160_s5 }
   0xb   :  { %108 = vmatpush.bf16.msra.mxu1 %v194_v4  ;;  %v203_v13 = vld [vmem:[%s337_s4] ss:$0 sm:$0xff] }
   0xc   :  { %146 = vmatpush.bf16.msra.mxu2 %v196_v12  ;;  %v204_v19 = vld [vmem:[%s339_s6] ss:$0 sm:$0xff] }
  0x87   :  { %v71_v6 = vpop.f32.mrf.mxu0 }
  0x88   :  { %v72_v7 = vadd.f32 %v202_v5, %v71_v6 }
  0x8a   :  { %v75_v8 = vmax.f32 %v72_v7, 0.0 }
  0x8c   :  { %v76_v9 = vpack.c.bf16 %v75_v8, %v75_v8 }
  0x8e   :  { %183 = vmatmul.msk.bf16.vlgmr.msra.gmra.mxu1 %vm97_vm1, %v76_v9 }
  0x8f   :  { %v73_v10 = vpop.f32.mrf.mxu0 }
 0x10b   :  { %v110_v14 = vpop.f32.mrf.mxu1 }
 0x10c   :  { %v111_v15 = vadd.f32 %v203_v13, %v110_v14 }
 0x10e   :  { %v114_v16 = vmax.f32 %v111_v15, 0.0 }
 0x110   :  { %v115_v17 = vpack.c.bf16 %v114_v16, %v114_v16 }
 0x112   :  { %192 = vmatmul.msk.bf16.vlgmr.msra.gmra.mxu2 %vm97_vm1, %v115_v17 }
 0x113   :  { %v112_v18 = vpop.f32.mrf.mxu1 }
 0x195   :  { %v148_v20 = vpop.f32.mrf.mxu2 }
 0x196   :  { %v149_v21 = vadd.f32 %v204_v19, %v148_v20 }
 0x198   :  { %152 = vst.msk [vmem:[#allocation5] sm:$0xff] %vm58_vm0, %v149_v21 }
 0x199   :  { %163 = dma.vmem_to_hbm [thread:$0]  %s159_s21, 128, %s161_s5, [#allocation4]  }
 0x19d   :  { %v150_v22 = vpop.f32.mrf.mxu2 }
 0x19e   :  { %255 = dma.done.wait [#allocation4], 128  }
 0x19f   :  { %256 = vsyncadd [#allocation4], 4294967168 }
 0x1a0   :  { %168 = vsyncpa [#allocation3], 1 }
 0x1a1   :  { %169 = vsyncpa [#allocation4], 1 }

</bundles_post_ra>
